<compile_context>
chip_gen: v5e
topology: v5e:2x2
jax: 0.10.0
libtpu: 0.0.40
codegen_flags: <defaults>
</compile_context>

<pallas_src>
import jax
import jax.numpy as jnp
from jax.experimental import pallas as pl
from jax.experimental.pallas import tpu as pltpu


def _linreg_kernel(w_ref, b_ref, x_ref, o_ref):
    # w_ref / b_ref are (1,) scalars in SMEM; x_ref / o_ref are VMEM tiles.
    o_ref[...] = w_ref[0] * x_ref[...] + b_ref[0]


def _linear_regression_2d(x, weights, bias, *, block_rows, block_cols):
    N, D = x.shape

    # Clamp tile dims: the full extent is always a legal block; when actually
    # tiling an axis, the block dim must respect the (8, 128) f32 rule.
    br = N if N <= block_rows else block_rows
    bc = D if D <= block_cols else block_cols
    if br != N:
        assert br % 8 == 0, "block_rows must be a multiple of 8 for f32"
    if bc != D:
        assert bc % 128 == 0, "block_cols must be a multiple of 128"

    grid = (pl.cdiv(N, br), pl.cdiv(D, bc))

    return pl.pallas_call(
        _linreg_kernel,
        out_shape=jax.ShapeDtypeStruct((N, D), x.dtype),
        grid=grid,
        in_specs=[
            pl.BlockSpec(memory_space=pltpu.SMEM),        # weights (1,)
            pl.BlockSpec(memory_space=pltpu.SMEM),        # bias    (1,)
            pl.BlockSpec((br, bc), lambda i, j: (i, j)),  # x tile
        ],
        out_specs=pl.BlockSpec((br, bc), lambda i, j: (i, j)),
        compiler_params=pltpu.CompilerParams(
            # Independent axes -> shard across the 2 TCs on v7x.
            dimension_semantics=("parallel", "parallel"),
            # Raise scoped VMEM (v5e default is only 16 MiB); live usage with
            # the default tile is ~16 MiB, well under v7x's 64 MiB physical.
            vmem_limit_bytes=64 << 20,
        ),
    )(weights, bias, x)


def _lane_dense_2d_shape(shape):
    """Pick a (rows, cols) factoring of the element count with a lane-dense
    (large multiple-of-128) last dim when possible; the op is elementwise so
    any factoring is semantically equivalent and the reshape is layout-free."""
    total = 1
    for s in shape:
        total *= s
    if total == 0:
        return (0, 1)
    for cols in (4096, 2048, 1024, 512, 256, 128):
        if total % cols == 0:
            return (total // cols, cols)
    # Fallback: keep the original trailing dim on lanes (edge stores masked).
    last = shape[-1] if len(shape) >= 1 else 1
    if last > 0 and total % last == 0:
        return (total // last, last)
    return (1, total)


def linear_regression(x, weights, bias, *, block_rows=512, block_cols=2048):
    """y = weights * x + bias with scalar broadcast (any input rank)."""
    weights = jnp.asarray(weights, dtype=x.dtype).reshape((1,))
    bias = jnp.asarray(bias, dtype=x.dtype).reshape((1,))

    orig_shape = x.shape
    if x.size == 0:
        return x  # nothing to do
    rows, cols = _lane_dense_2d_shape(x.shape if x.ndim > 0 else (1,))
    x2 = x.reshape(rows, cols)

    y2 = _linear_regression_2d(
        x2, weights, bias, block_rows=block_rows, block_cols=block_cols
    )
    return y2.reshape(orig_shape)


if __name__ == "__main__":
    key = jax.random.PRNGKey(0)
    kw, kb, k1, k2, k3 = jax.random.split(key, 5)

    # Deterministic "parameters" matching nn.Parameter(torch.randn(1)) shapes.
    weights = jax.random.normal(kw, (1,), dtype=jnp.float32)
    bias = jax.random.normal(kb, (1,), dtype=jnp.float32)

    # Small 4-D demo input (batch=2, channels=4, 16x16 spatial): 2048 elements
    # -> refactored to a single lane-dense (1, 2048) block (one DMA in/out).
    x_small = jax.random.normal(k1, (2, 4, 16, 16), dtype=jnp.float32)
    y_small = jax.block_until_ready(linear_regression(x_small, weights, bias))
    ref_small = weights[0] * x_small + bias[0]
    assert jnp.allclose(y_small, ref_small, atol=1e-6), "small-input mismatch"

    # Larger input exercising the 2-D tiled path: 1040*2560 elements
    # -> (1300, 2048) slab, grid (3, 1) with a partial final row block.
    x_big = jax.random.normal(k2, (1040, 2560), dtype=jnp.float32)
    y_big = jax.block_until_ready(linear_regression(x_big, weights, bias))
    ref_big = weights[0] * x_big + bias[0]
    assert jnp.allclose(y_big, ref_big, atol=1e-6), "tiled-input mismatch"

    # Awkward odd shape (element count not divisible by 128): falls back to
    # keeping the trailing dim on lanes; still a single full-extent block.
    x_odd = jax.random.normal(k3, (7, 130), dtype=jnp.float32)
    y_odd = jax.block_until_ready(linear_regression(x_odd, weights, bias))
    ref_odd = weights[0] * x_odd + bias[0]
    assert jnp.allclose(y_odd, ref_odd, atol=1e-6), "odd-shape mismatch"

    print("KERNEL_OK")
</pallas_src>

<mosaic_0001>
module attributes {stable_mosaic.version = 11 : i64} {
  func.func @_linreg_kernel(%arg0: i32, %arg1: i32, %arg2: memref<1xf32, #tpu.memory_space<smem>>, %arg3: memref<1xf32, #tpu.memory_space<smem>>, %arg4: memref<1x2048xf32, #tpu.memory_space<vmem>>, %arg5: memref<1x2048xf32, #tpu.memory_space<vmem>>) attributes {dimension_semantics = [#tpu.dimension_semantics<parallel>, #tpu.dimension_semantics<parallel>], iteration_bounds = array<i64: 1, 1>, scalar_prefetch = 0 : i64, scratch_operands = 0 : i64, tpu.core_type = #tpu.core_type<tc>, window_params = [{transform_indices = @transform_0, window_bounds = array<i64: 1>}, {transform_indices = @transform_1, window_bounds = array<i64: 1>}, {transform_indices = @transform_2, window_bounds = array<i64: 1, 2048>}, {transform_indices = @transform_3, window_bounds = array<i64: 1, 2048>}]} {
    %c0 = arith.constant 0 : index
    %0 = memref.load %arg2[%c0] : memref<1xf32, #tpu.memory_space<smem>>
    %c0_0 = arith.constant 0 : index
    %c0_1 = arith.constant 0 : index
    %1 = vector.load %arg4[%c0_0, %c0_1] : memref<1x2048xf32, #tpu.memory_space<vmem>>, vector<1x2048xf32>
    %2 = vector.broadcast %0 : f32 to vector<1x2048xf32>
    %3 = arith.mulf %2, %1 : vector<1x2048xf32>
    %c0_2 = arith.constant 0 : index
    %4 = memref.load %arg3[%c0_2] : memref<1xf32, #tpu.memory_space<smem>>
    %5 = vector.broadcast %4 : f32 to vector<1x2048xf32>
    %6 = arith.addf %3, %5 : vector<1x2048xf32>
    %c0_3 = arith.constant 0 : index
    %c0_4 = arith.constant 0 : index
    %7 = vector.load %arg5[%c0_3, %c0_4] : memref<1x2048xf32, #tpu.memory_space<vmem>>, vector<1x2048xf32>
    tpu.vector_store %arg5[%c0_3, %c0_4], %6 {strides = array<i32>} : memref<1x2048xf32, #tpu.memory_space<vmem>>, vector<1x2048xf32>,
    return
  }
  func.func @transform_0(%arg0: i32, %arg1: i32) -> i32 {
    %c0_i32 = arith.constant 0 : i32
    %c0_i32_0 = arith.constant 0 : i32
    return %c0_i32 : i32
  }
  func.func @transform_1(%arg0: i32, %arg1: i32) -> i32 {
    %c0_i32 = arith.constant 0 : i32
    %c0_i32_0 = arith.constant 0 : i32
    return %c0_i32 : i32
  }
  func.func @transform_2(%arg0: i32, %arg1: i32) -> (i32, i32) {
    %c0_i32 = arith.constant 0 : i32
    return %arg0, %arg1 : i32, i32
  }
  func.func @transform_3(%arg0: i32, %arg1: i32) -> (i32, i32) {
    %c0_i32 = arith.constant 0 : i32
    return %arg0, %arg1 : i32, i32
  }
}

</mosaic_0001>

<bundles_post_ra>
// kernel: tpu_custom_call.1
= control target key start
LH: loop header
LB: loop body
LE: loop exit
PB: predicated region body
PF: predicated region fallthrough
CT: control target
= control target key end

     0   :  { %10 = vsyncpa [#allocation5], 0  ;;  %s148_s0 = inlined_call_operand.<no memory space> [shape: f32[1], index: 0, kind: input, shape index: {}]   ;;  %s149_s1 = inlined_call_operand.<no memory space> [shape: f32[1], index: 1, kind: input, shape index: {}]   ;;  %s150_s2 = inlined_call_operand.hbm [shape: f32[1,2048], index: 2, kind: input, shape index: {}]   ;;  %s151_s3 = inlined_call_operand.hbm [shape: f32[1,2048], index: 3, kind: output, shape index: {}]  }
   0x1   :  { %11 = vsyncpa [#allocation6], 0  ;;  %s21_s14 = sshll.u32 %s150_s2, 4  ;;  %s114_s15 = smov [#allocation4]   ;;  %s22_s14 = int_to_ptr.hbm [resolvable:$true] %s21_s14 }
   0x2   :  { %s23_s16 = sshll.u32 %s114_s15, 4  ;;  %s24_s16 = int_to_ptr.vmem [resolvable:$true] %s23_s16 }
   0x3   :  { %26 = dma.hbm_to_vmem [thread:$0]  %s22_s14, 256, %s24_s16, [#allocation5]  }
   0x4   :  { %110 = dma.done.wait [#allocation5], 256  }
   0x5   :  { %111 = vsyncadd [#allocation5], 4294967040  ;;  %v34_v0 = vstv %s148_s0  ;;  %v32_v1 = vld [vmem:[#allocation4] sm:$0xff]  ;;  %v38_v2 = vstv %s149_s1  ;;  %v33_v3 = vld [vmem:[#allocation4 + $0x8] sm:$0xff]  ;;  %s115_s2 = smov [#allocation7]   ;;  %s50_s24 = sshll.u32 %s151_s3, 4  ;;  %s51_s24 = int_to_ptr.hbm [resolvable:$true] %s50_s24 }
   0x6   :  { %v35_v4 = vmul.f32 %v34_v0, %v32_v1  ;;  %v36_v5 = vmul.f32 %v34_v0, %v33_v3  ;;  %s48_s21 = sshll.u32 %s115_s2, 4  ;;  %s49_s21 = int_to_ptr.vmem [resolvable:$true] %s48_s21 }
   0x8   :  { %v39_v6 = vadd.f32 %v38_v2, %v35_v4  ;;  %v40_v7 = vadd.f32 %v38_v2, %v36_v5 }
   0xa   :  { %41 = vst [vmem:[#allocation7] sm:$0xff] %v39_v6 }
   0xb   :  { %42 = vst [vmem:[#allocation7 + $0x8] sm:$0xff] %v40_v7 }
   0xc   :  { %53 = dma.vmem_to_hbm [thread:$0]  %s49_s21, 256, %s51_s24, [#allocation6]  }
   0xd   :  { %112 = dma.done.wait [#allocation6], 256  }
   0xe   :  { %113 = vsyncadd [#allocation6], 4294967040 }
   0xf   :  { %58 = vsyncpa [#allocation5], 1 }
  0x10   :  { %59 = vsyncpa [#allocation6], 1 }

</bundles_post_ra>
